<compile_context>
chip_gen: v5e
topology: v5e:2x2
jax: 0.10.0
libtpu: 0.0.40
codegen_flags: <defaults>
</compile_context>

<pallas_src>
import jax
import jax.numpy as jnp
from jax import lax
from jax.experimental import pallas as pl
from jax.experimental.pallas import tpu as pltpu


def _round_up(x, m):
    return (x + m - 1) // m * m


def _knn_dir_kernel(q_ref, c_ref, dist_ref, idx_ref):
    """One direction of KNN.

    q_ref:    (1, D, TN)  queries, transposed (query points on the lane axis)
    c_ref:    (1, TM, D)  candidate chunk (candidate points on the sublane axis)
    dist_ref: (1, K, TN)  running / final squared distances (lane-dense)
    idx_ref:  (1, K, TN)  running / final candidate indices (lane-dense)

    Grid = (B, N_tiles, M_tiles); the M_tiles axis is a streamed reduction ("arbitrary"),
    the output block is resident across it and used directly as the top-k accumulator.
    """
    mi = pl.program_id(2)

    tm = c_ref.shape[1]
    tn = q_ref.shape[2]
    k = dist_ref.shape[1]
    d_dim = q_ref.shape[1]

    # Initialize the running top-k on the first candidate chunk.
    @pl.when(mi == 0)
    def _():
        dist_ref[...] = jnp.full(dist_ref.shape, jnp.inf, dtype=dist_ref.dtype)
        idx_ref[...] = jnp.zeros(idx_ref.shape, dtype=idx_ref.dtype)

    q = q_ref[0].astype(jnp.float32)   # [D, TN]
    c = c_ref[0].astype(jnp.float32)   # [TM, D]

    # Exact squared distances, block layout [TM, TN]: work[m, n] = sum_d (c[m,d] - q[d,n])^2.
    # Pure VPU broadcast-sub-square-add; no [N, M] matrix, no transpose, no MXU needed.
    work = None
    for dd in range(d_dim):
        diff = c[:, dd:dd + 1] - q[dd:dd + 1, :]        # [TM,1] - [1,TN] -> [TM, TN]
        sq = diff * diff
        work = sq if work is None else work + sq

    # Global candidate ids for this chunk (candidate index on the sublane axis).
    row_ids = lax.broadcasted_iota(jnp.int32, (tm, tn), 0) + mi * tm   # [TM, TN]
    k_iota = lax.broadcasted_iota(jnp.int32, (k, tn), 0)               # [K,  TN]

    # Snapshot of the running best (sorted ascending from previous chunks; +inf on first chunk).
    run_d = dist_ref[0]   # [K, TN]
    run_i = idx_ref[0]    # [K, TN]

    big = jnp.int32(2 ** 30)

    # k unrolled selection passes: each pass picks the global t-th smallest among
    # (running best  U  current chunk) and writes it directly into row t of the output block.
    for t in range(k):
        # Best remaining candidate in the current chunk.
        b_min = jnp.min(work, axis=0, keepdims=True)                             # [1, TN]
        is_min = work == b_min
        b_arg = jnp.min(jnp.where(is_min, row_ids, big), axis=0, keepdims=True)  # [1, TN]

        # Best remaining entry of the running set (tiny [K, TN] ops).
        r_min = jnp.min(run_d, axis=0, keepdims=True)                            # [1, TN]
        r_row = jnp.min(jnp.where(run_d == r_min, k_iota, jnp.int32(k)),
                        axis=0, keepdims=True)                                   # [1, TN]
        r_idx = jnp.min(jnp.where(k_iota == r_row, run_i, big),
                        axis=0, keepdims=True)                                   # [1, TN]

        # Running-set entries always come from earlier chunks (smaller global index), so
        # preferring them on ties gives stable smallest-index-first tie-breaking.
        use_run = r_min <= b_min                                                 # [1, TN]

        dist_ref[0, t, :] = jnp.where(use_run, r_min, b_min)[0]
        idx_ref[0, t, :] = jnp.where(use_run, r_idx, b_arg)[0]

        # Consume the chosen element from whichever source it came from.
        b_arg_eff = jnp.where(use_run, jnp.int32(-1), b_arg)                     # [1, TN]
        work = jnp.where(row_ids == b_arg_eff, jnp.inf, work)
        r_row_eff = jnp.where(use_run, r_row, jnp.int32(-1))                     # [1, TN]
        run_d = jnp.where(k_iota == r_row_eff, jnp.inf, run_d)


def _knn_onedir(queries, candidates, k, tn_max=512, tm_max=512):
    """For each point in `queries` [B,N,D], find k nearest points in `candidates` [B,M,D].

    Returns (squared distances [B, N, k] f32, indices [B, N, k] i32).
    """
    B, N, D = queries.shape
    B2, M, D2 = candidates.shape
    assert B == B2 and D == D2
    assert k >= 1 and k <= M, "k must be in [1, num_candidate_points]"

    # Tile sizes: queries on the lane axis (multiple of 128), candidates on sublanes (mult of 8).
    tn = min(tn_max, _round_up(N, 128))
    n_pad = _round_up(N, tn)
    tm = min(tm_max, _round_up(M, 8))
    m_pad = _round_up(M, tm)
    assert tm >= k, "candidate tile must hold at least k points"

    qf = queries.astype(jnp.float32)
    cf = candidates.astype(jnp.float32)

    # Queries transposed to [B, D, N_pad] (lane-dense); padded queries give junk rows we slice off.
    q_t = jnp.transpose(qf, (0, 2, 1))
    if n_pad > N:
        q_t = jnp.pad(q_t, ((0, 0), (0, 0), (0, n_pad - N)))
    # Candidates padded along M with a huge-but-finite sentinel so padded points are never selected.
    if m_pad > M:
        cf = jnp.pad(cf, ((0, 0), (0, m_pad - M), (0, 0)), constant_values=1e18)

    grid = (B, n_pad // tn, m_pad // tm)

    dist, idx = pl.pallas_call(
        _knn_dir_kernel,
        out_shape=(
            jax.ShapeDtypeStruct((B, k, n_pad), jnp.float32),
            jax.ShapeDtypeStruct((B, k, n_pad), jnp.int32),
        ),
        grid_spec=pltpu.PrefetchScalarGridSpec(
            num_scalar_prefetch=0,
            grid=grid,
            in_specs=[
                pl.BlockSpec((1, D, tn), lambda b, ni, mi: (b, 0, ni)),
                pl.BlockSpec((1, tm, D), lambda b, ni, mi: (b, mi, 0)),
            ],
            out_specs=[
                pl.BlockSpec((1, k, tn), lambda b, ni, mi: (b, 0, ni)),
                pl.BlockSpec((1, k, tn), lambda b, ni, mi: (b, 0, ni)),
            ],
        ),
        compiler_params=pltpu.CompilerParams(
            dimension_semantics=("parallel", "parallel", "arbitrary")),
    )(q_t, cf)

    # Lane-dense [B, k, N_pad] -> module layout [B, N, k].
    dist = jnp.transpose(dist[:, :, :N], (0, 2, 1))
    idx = jnp.transpose(idx[:, :, :N], (0, 2, 1))
    return dist, idx


def k_nearest_neighbor(input1, input2, k):
    """Bidirectional KNN. Returns squared distances + int32 indices:
    dist1 [B,N,k], dist2 [B,M,k], idx1 [B,N,k], idx2 [B,M,k]."""
    dist1, idx1 = _knn_onedir(input1, input2, k)
    dist2, idx2 = _knn_onedir(input2, input1, k)
    return dist1, dist2, idx1, idx2


def knn_module_forward(input1, input2, k, bilateral, return_distance, return_index):
    """Mirrors knnModule.forward branching exactly (direction 2 only computed when needed)."""
    dist1, idx1 = _knn_onedir(input1, input2, k)
    if bilateral:
        dist2, idx2 = _knn_onedir(input2, input1, k)
    else:
        dist2, idx2 = None, None

    if return_distance and return_index:
        if bilateral:
            return (jnp.sqrt(dist1), jnp.sqrt(dist2), idx1, idx2)
        else:
            return (jnp.sqrt(dist1), idx1)
    elif return_distance and (not return_index):
        if bilateral:
            return (jnp.sqrt(dist1), jnp.sqrt(dist2))
        else:
            return jnp.sqrt(dist1)
    elif (not return_distance) and return_index:
        if bilateral:
            return (idx1, idx2)
        else:
            return idx1
    else:
        return None


if __name__ == "__main__":
    key = jax.random.PRNGKey(0)
    k1, k2 = jax.random.split(key)

    B, N, M, D, K = 2, 16, 16, 3, 4
    input1 = jax.random.normal(k1, (B, N, D), dtype=jnp.float32)
    input2 = jax.random.normal(k2, (B, M, D), dtype=jnp.float32)

    out = knn_module_forward(input1, input2, K,
                             bilateral=True, return_distance=True, return_index=True)
    out = jax.block_until_ready(out)
    d1, d2, i1, i2 = out

    # pure-JAX reference
    diff = input1[:, :, None, :] - input2[:, None, :, :]
    dmat = jnp.sum(diff * diff, axis=-1)                           # [B, N, M]
    d1_ref = jnp.sqrt(jnp.sort(dmat, axis=-1)[..., :K])
    i1_ref = jnp.argsort(dmat, axis=-1)[..., :K].astype(jnp.int32)
    dmat_t = jnp.swapaxes(dmat, 1, 2)                              # [B, M, N]
    d2_ref = jnp.sqrt(jnp.sort(dmat_t, axis=-1)[..., :K])
    i2_ref = jnp.argsort(dmat_t, axis=-1)[..., :K].astype(jnp.int32)

    assert jnp.allclose(d1, d1_ref, atol=1e-4), "dist1 mismatch"
    assert jnp.array_equal(i1, i1_ref), "idx1 mismatch"
    assert jnp.allclose(d2, d2_ref, atol=1e-4), "dist2 mismatch"
    assert jnp.array_equal(i2, i2_ref), "idx2 mismatch"

    print("KERNEL_OK")
</pallas_src>

<mosaic_0001>
module attributes {stable_mosaic.version = 11 : i64} {
  func.func @_knn_dir_kernel(%arg0: i32, %arg1: i32, %arg2: i32, %arg3: memref<1x3x128xf32, #tpu.memory_space<vmem>>, %arg4: memref<1x16x3xf32, #tpu.memory_space<vmem>>, %arg5: memref<1x4x128xf32, #tpu.memory_space<vmem>>, %arg6: memref<1x4x128xi32, #tpu.memory_space<vmem>>) attributes {dimension_semantics = [#tpu.dimension_semantics<parallel>, #tpu.dimension_semantics<parallel>, #tpu.dimension_semantics<arbitrary>], iteration_bounds = array<i64: 2, 1, 1>, scalar_prefetch = 0 : i64, scratch_operands = 0 : i64, tpu.core_type = #tpu.core_type<tc>, window_params = [{transform_indices = @transform_0, window_bounds = array<i64: 1, 3, 128>}, {transform_indices = @transform_1, window_bounds = array<i64: 1, 16, 3>}, {transform_indices = @transform_2, window_bounds = array<i64: 1, 4, 128>}, {transform_indices = @transform_3, window_bounds = array<i64: 1, 4, 128>}]} {
    %c0_i32 = arith.constant 0 : i32
    %0 = arith.cmpi eq, %arg2, %c0_i32 : i32
    %1 = arith.extui %0 : i1 to i32
    %c0_i32_0 = arith.constant 0 : i32
    %2 = arith.cmpi ne, %1, %c0_i32_0 : i32
    scf.if %2 {
      %cst_73 = arith.constant 0x7F800000 : f32
      %204 = vector.broadcast %cst_73 : f32 to vector<1x4x128xf32>
      %c0_74 = arith.constant 0 : index
      %c0_75 = arith.constant 0 : index
      %c0_76 = arith.constant 0 : index
      %205 = vector.load %arg5[%c0_74, %c0_75, %c0_76] : memref<1x4x128xf32, #tpu.memory_space<vmem>>, vector<1x4x128xf32>
      tpu.vector_store %arg5[%c0_74, %c0_75, %c0_76], %204 {strides = array<i32>} : memref<1x4x128xf32, #tpu.memory_space<vmem>>, vector<1x4x128xf32>,
      %c0_i32_77 = arith.constant 0 : i32
      %206 = vector.broadcast %c0_i32_77 : i32 to vector<1x4x128xi32>
      %c0_78 = arith.constant 0 : index
      %c0_79 = arith.constant 0 : index
      %c0_80 = arith.constant 0 : index
      %207 = vector.load %arg6[%c0_78, %c0_79, %c0_80] : memref<1x4x128xi32, #tpu.memory_space<vmem>>, vector<1x4x128xi32>
      tpu.vector_store %arg6[%c0_78, %c0_79, %c0_80], %206 {strides = array<i32>} : memref<1x4x128xi32, #tpu.memory_space<vmem>>, vector<1x4x128xi32>,
    } else {
    }
    %c0 = arith.constant 0 : index
    %c0_1 = arith.constant 0 : index
    %c0_2 = arith.constant 0 : index
    %3 = vector.load %arg3[%c0, %c0_1, %c0_2] : memref<1x3x128xf32, #tpu.memory_space<vmem>>, vector<1x3x128xf32>
    %4 = vector.shape_cast %3 : vector<1x3x128xf32> to vector<3x128xf32>
    %c0_3 = arith.constant 0 : index
    %c0_4 = arith.constant 0 : index
    %c0_5 = arith.constant 0 : index
    %5 = vector.load %arg4[%c0_3, %c0_4, %c0_5] : memref<1x16x3xf32, #tpu.memory_space<vmem>>, vector<1x16x3xf32>
    %6 = vector.shape_cast %5 : vector<1x16x3xf32> to vector<16x3xf32>
    %7 = vector.extract_strided_slice %6 {offsets = [0, 0], sizes = [16, 1], strides = [1, 1]} : vector<16x3xf32> to vector<16x1xf32>
    %8 = vector.extract_strided_slice %4 {offsets = [0, 0], sizes = [1, 128], strides = [1, 1]} : vector<3x128xf32> to vector<1x128xf32>
    %9 = vector.broadcast %7 : vector<16x1xf32> to vector<16x128xf32>
    %10 = vector.broadcast %8 : vector<1x128xf32> to vector<16x128xf32>
    %11 = arith.subf %9, %10 : vector<16x128xf32>
    %12 = arith.mulf %11, %11 : vector<16x128xf32>
    %13 = vector.extract_strided_slice %6 {offsets = [0, 1], sizes = [16, 1], strides = [1, 1]} : vector<16x3xf32> to vector<16x1xf32>
    %14 = vector.extract_strided_slice %4 {offsets = [1, 0], sizes = [1, 128], strides = [1, 1]} : vector<3x128xf32> to vector<1x128xf32>
    %15 = vector.broadcast %13 : vector<16x1xf32> to vector<16x128xf32>
    %16 = vector.broadcast %14 : vector<1x128xf32> to vector<16x128xf32>
    %17 = arith.subf %15, %16 : vector<16x128xf32>
    %18 = arith.mulf %17, %17 : vector<16x128xf32>
    %19 = arith.addf %12, %18 : vector<16x128xf32>
    %20 = vector.extract_strided_slice %6 {offsets = [0, 2], sizes = [16, 1], strides = [1, 1]} : vector<16x3xf32> to vector<16x1xf32>
    %21 = vector.extract_strided_slice %4 {offsets = [2, 0], sizes = [1, 128], strides = [1, 1]} : vector<3x128xf32> to vector<1x128xf32>
    %22 = vector.broadcast %20 : vector<16x1xf32> to vector<16x128xf32>
    %23 = vector.broadcast %21 : vector<1x128xf32> to vector<16x128xf32>
    %24 = arith.subf %22, %23 : vector<16x128xf32>
    %25 = arith.mulf %24, %24 : vector<16x128xf32>
    %26 = arith.addf %19, %25 : vector<16x128xf32>
    %27 = tpu.iota {dimensions = array<i32: 0>} : vector<16x128xi32>
    %c16_i32 = arith.constant 16 : i32
    %28 = arith.muli %arg2, %c16_i32 : i32
    %29 = vector.broadcast %28 : i32 to vector<16x128xi32>
    %30 = arith.addi %27, %29 : vector<16x128xi32>
    %31 = tpu.iota {dimensions = array<i32: 0>} : vector<4x128xi32>
    %c0_6 = arith.constant 0 : index
    %c0_7 = arith.constant 0 : index
    %c0_8 = arith.constant 0 : index
    %32 = vector.load %arg5[%c0_6, %c0_7, %c0_8] : memref<1x4x128xf32, #tpu.memory_space<vmem>>, vector<1x4x128xf32>
    %33 = vector.shape_cast %32 : vector<1x4x128xf32> to vector<4x128xf32>
    %c0_9 = arith.constant 0 : index
    %c0_10 = arith.constant 0 : index
    %c0_11 = arith.constant 0 : index
    %34 = vector.load %arg6[%c0_9, %c0_10, %c0_11] : memref<1x4x128xi32, #tpu.memory_space<vmem>>, vector<1x4x128xi32>
    %35 = vector.shape_cast %34 : vector<1x4x128xi32> to vector<4x128xi32>
    %cst = arith.constant dense<0x7F800000> : vector<128xf32>
    %36 = vector.multi_reduction <minimumf>, %26, %cst [0] : vector<16x128xf32> to vector<128xf32>
    %37 = vector.shape_cast %36 : vector<128xf32> to vector<1x128xf32>
    %38 = vector.broadcast %37 : vector<1x128xf32> to vector<16x128xf32>
    %39 = arith.cmpf oeq, %26, %38 : vector<16x128xf32>
    %c1073741824_i32 = arith.constant 1073741824 : i32
    %40 = vector.broadcast %c1073741824_i32 : i32 to vector<16x128xi32>
    %41 = arith.select %39, %30, %40 : vector<16x128xi1>, vector<16x128xi32>
    %cst_12 = arith.constant dense<2147483647> : vector<128xi32>
    %42 = vector.multi_reduction <minsi>, %41, %cst_12 [0] : vector<16x128xi32> to vector<128xi32>
    %43 = vector.shape_cast %42 : vector<128xi32> to vector<1x128xi32>
    %cst_13 = arith.constant dense<0x7F800000> : vector<128xf32>
    %44 = vector.multi_reduction <minimumf>, %33, %cst_13 [0] : vector<4x128xf32> to vector<128xf32>
    %45 = vector.shape_cast %44 : vector<128xf32> to vector<1x128xf32>
    %46 = vector.broadcast %45 : vector<1x128xf32> to vector<4x128xf32>
    %47 = arith.cmpf oeq, %33, %46 : vector<4x128xf32>
    %c4_i32 = arith.constant 4 : i32
    %48 = vector.broadcast %c4_i32 : i32 to vector<4x128xi32>
    %49 = arith.select %47, %31, %48 : vector<4x128xi1>, vector<4x128xi32>
    %cst_14 = arith.constant dense<2147483647> : vector<128xi32>
    %50 = vector.multi_reduction <minsi>, %49, %cst_14 [0] : vector<4x128xi32> to vector<128xi32>
    %51 = vector.shape_cast %50 : vector<128xi32> to vector<1x128xi32>
    %52 = vector.broadcast %51 : vector<1x128xi32> to vector<4x128xi32>
    %53 = arith.cmpi eq, %31, %52 : vector<4x128xi32>
    %c1073741824_i32_15 = arith.constant 1073741824 : i32
    %54 = vector.broadcast %c1073741824_i32_15 : i32 to vector<4x128xi32>
    %55 = arith.select %53, %35, %54 : vector<4x128xi1>, vector<4x128xi32>
    %cst_16 = arith.constant dense<2147483647> : vector<128xi32>
    %56 = vector.multi_reduction <minsi>, %55, %cst_16 [0] : vector<4x128xi32> to vector<128xi32>
    %57 = vector.shape_cast %56 : vector<128xi32> to vector<1x128xi32>
    %58 = arith.cmpf ole, %45, %37 : vector<1x128xf32>
    %59 = arith.select %58, %45, %37 : vector<1x128xi1>, vector<1x128xf32>
    %60 = vector.shape_cast %59 : vector<1x128xf32> to vector<128xf32>
    %c0_17 = arith.constant 0 : index
    %c0_18 = arith.constant 0 : index
    %c0_19 = arith.constant 0 : index
    %61 = vector.load %arg5[%c0_17, %c0_18, %c0_19] : memref<1x4x128xf32, #tpu.memory_space<vmem>>, vector<1x1x128xf32>
    %62 = vector.shape_cast %61 : vector<1x1x128xf32> to vector<128xf32>
    %63 = vector.shape_cast %60 : vector<128xf32> to vector<1x1x128xf32>
    tpu.vector_store %arg5[%c0_17, %c0_18, %c0_19], %63 {strides = array<i32>} : memref<1x4x128xf32, #tpu.memory_space<vmem>>, vector<1x1x128xf32>,
    %64 = arith.select %58, %57, %43 : vector<1x128xi1>, vector<1x128xi32>
    %65 = vector.shape_cast %64 : vector<1x128xi32> to vector<128xi32>
    %c0_20 = arith.constant 0 : index
    %c0_21 = arith.constant 0 : index
    %c0_22 = arith.constant 0 : index
    %66 = vector.load %arg6[%c0_20, %c0_21, %c0_22] : memref<1x4x128xi32, #tpu.memory_space<vmem>>, vector<1x1x128xi32>
    %67 = vector.shape_cast %66 : vector<1x1x128xi32> to vector<128xi32>
    %68 = vector.shape_cast %65 : vector<128xi32> to vector<1x1x128xi32>
    tpu.vector_store %arg6[%c0_20, %c0_21, %c0_22], %68 {strides = array<i32>} : memref<1x4x128xi32, #tpu.memory_space<vmem>>, vector<1x1x128xi32>,
    %c-1_i32 = arith.constant -1 : i32
    %69 = vector.broadcast %c-1_i32 : i32 to vector<1x128xi32>
    %70 = arith.select %58, %69, %43 : vector<1x128xi1>, vector<1x128xi32>
    %71 = vector.broadcast %70 : vector<1x128xi32> to vector<16x128xi32>
    %72 = arith.cmpi eq, %30, %71 : vector<16x128xi32>
    %cst_23 = arith.constant 0x7F800000 : f32
    %73 = vector.broadcast %cst_23 : f32 to vector<16x128xf32>
    %74 = arith.select %72, %73, %26 : vector<16x128xi1>, vector<16x128xf32>
    %c-1_i32_24 = arith.constant -1 : i32
    %75 = vector.broadcast %c-1_i32_24 : i32 to vector<1x128xi32>
    %76 = arith.select %58, %51, %75 : vector<1x128xi1>, vector<1x128xi32>
    %77 = vector.broadcast %76 : vector<1x128xi32> to vector<4x128xi32>
    %78 = arith.cmpi eq, %31, %77 : vector<4x128xi32>
    %cst_25 = arith.constant 0x7F800000 : f32
    %79 = vector.broadcast %cst_25 : f32 to vector<4x128xf32>
    %80 = arith.select %78, %79, %33 : vector<4x128xi1>, vector<4x128xf32>
    %cst_26 = arith.constant dense<0x7F800000> : vector<128xf32>
    %81 = vector.multi_reduction <minimumf>, %74, %cst_26 [0] : vector<16x128xf32> to vector<128xf32>
    %82 = vector.shape_cast %81 : vector<128xf32> to vector<1x128xf32>
    %83 = vector.broadcast %82 : vector<1x128xf32> to vector<16x128xf32>
    %84 = arith.cmpf oeq, %74, %83 : vector<16x128xf32>
    %c1073741824_i32_27 = arith.constant 1073741824 : i32
    %85 = vector.broadcast %c1073741824_i32_27 : i32 to vector<16x128xi32>
    %86 = arith.select %84, %30, %85 : vector<16x128xi1>, vector<16x128xi32>
    %cst_28 = arith.constant dense<2147483647> : vector<128xi32>
    %87 = vector.multi_reduction <minsi>, %86, %cst_28 [0] : vector<16x128xi32> to vector<128xi32>
    %88 = vector.shape_cast %87 : vector<128xi32> to vector<1x128xi32>
    %cst_29 = arith.constant dense<0x7F800000> : vector<128xf32>
    %89 = vector.multi_reduction <minimumf>, %80, %cst_29 [0] : vector<4x128xf32> to vector<128xf32>
    %90 = vector.shape_cast %89 : vector<128xf32> to vector<1x128xf32>
    %91 = vector.broadcast %90 : vector<1x128xf32> to vector<4x128xf32>
    %92 = arith.cmpf oeq, %80, %91 : vector<4x128xf32>
    %c4_i32_30 = arith.constant 4 : i32
    %93 = vector.broadcast %c4_i32_30 : i32 to vector<4x128xi32>
    %94 = arith.select %92, %31, %93 : vector<4x128xi1>, vector<4x128xi32>
    %cst_31 = arith.constant dense<2147483647> : vector<128xi32>
    %95 = vector.multi_reduction <minsi>, %94, %cst_31 [0] : vector<4x128xi32> to vector<128xi32>
    %96 = vector.shape_cast %95 : vector<128xi32> to vector<1x128xi32>
    %97 = vector.broadcast %96 : vector<1x128xi32> to vector<4x128xi32>
    %98 = arith.cmpi eq, %31, %97 : vector<4x128xi32>
    %c1073741824_i32_32 = arith.constant 1073741824 : i32
    %99 = vector.broadcast %c1073741824_i32_32 : i32 to vector<4x128xi32>
    %100 = arith.select %98, %35, %99 : vector<4x128xi1>, vector<4x128xi32>
    %cst_33 = arith.constant dense<2147483647> : vector<128xi32>
    %101 = vector.multi_reduction <minsi>, %100, %cst_33 [0] : vector<4x128xi32> to vector<128xi32>
    %102 = vector.shape_cast %101 : vector<128xi32> to vector<1x128xi32>
    %103 = arith.cmpf ole, %90, %82 : vector<1x128xf32>
    %104 = arith.select %103, %90, %82 : vector<1x128xi1>, vector<1x128xf32>
    %105 = vector.shape_cast %104 : vector<1x128xf32> to vector<128xf32>
    %c0_34 = arith.constant 0 : index
    %c1 = arith.constant 1 : index
    %c0_35 = arith.constant 0 : index
    %106 = vector.load %arg5[%c0_34, %c1, %c0_35] : memref<1x4x128xf32, #tpu.memory_space<vmem>>, vector<1x1x128xf32>
    %107 = vector.shape_cast %106 : vector<1x1x128xf32> to vector<128xf32>
    %108 = vector.shape_cast %105 : vector<128xf32> to vector<1x1x128xf32>
    tpu.vector_store %arg5[%c0_34, %c1, %c0_35], %108 {strides = array<i32>} : memref<1x4x128xf32, #tpu.memory_space<vmem>>, vector<1x1x128xf32>,
    %109 = arith.select %103, %102, %88 : vector<1x128xi1>, vector<1x128xi32>
    %110 = vector.shape_cast %109 : vector<1x128xi32> to vector<128xi32>
    %c0_36 = arith.constant 0 : index
    %c1_37 = arith.constant 1 : index
    %c0_38 = arith.constant 0 : index
    %111 = vector.load %arg6[%c0_36, %c1_37, %c0_38] : memref<1x4x128xi32, #tpu.memory_space<vmem>>, vector<1x1x128xi32>
    %112 = vector.shape_cast %111 : vector<1x1x128xi32> to vector<128xi32>
    %113 = vector.shape_cast %110 : vector<128xi32> to vector<1x1x128xi32>
    tpu.vector_store %arg6[%c0_36, %c1_37, %c0_38], %113 {strides = array<i32>} : memref<1x4x128xi32, #tpu.memory_space<vmem>>, vector<1x1x128xi32>,
    %c-1_i32_39 = arith.constant -1 : i32
    %114 = vector.broadcast %c-1_i32_39 : i32 to vector<1x128xi32>
    %115 = arith.select %103, %114, %88 : vector<1x128xi1>, vector<1x128xi32>
    %116 = vector.broadcast %115 : vector<1x128xi32> to vector<16x128xi32>
    %117 = arith.cmpi eq, %30, %116 : vector<16x128xi32>
    %cst_40 = arith.constant 0x7F800000 : f32
    %118 = vector.broadcast %cst_40 : f32 to vector<16x128xf32>
    %119 = arith.select %117, %118, %74 : vector<16x128xi1>, vector<16x128xf32>
    %c-1_i32_41 = arith.constant -1 : i32
    %120 = vector.broadcast %c-1_i32_41 : i32 to vector<1x128xi32>
    %121 = arith.select %103, %96, %120 : vector<1x128xi1>, vector<1x128xi32>
    %122 = vector.broadcast %121 : vector<1x128xi32> to vector<4x128xi32>
    %123 = arith.cmpi eq, %31, %122 : vector<4x128xi32>
    %cst_42 = arith.constant 0x7F800000 : f32
    %124 = vector.broadcast %cst_42 : f32 to vector<4x128xf32>
    %125 = arith.select %123, %124, %80 : vector<4x128xi1>, vector<4x128xf32>
    %cst_43 = arith.constant dense<0x7F800000> : vector<128xf32>
    %126 = vector.multi_reduction <minimumf>, %119, %cst_43 [0] : vector<16x128xf32> to vector<128xf32>
    %127 = vector.shape_cast %126 : vector<128xf32> to vector<1x128xf32>
    %128 = vector.broadcast %127 : vector<1x128xf32> to vector<16x128xf32>
    %129 = arith.cmpf oeq, %119, %128 : vector<16x128xf32>
    %c1073741824_i32_44 = arith.constant 1073741824 : i32
    %130 = vector.broadcast %c1073741824_i32_44 : i32 to vector<16x128xi32>
    %131 = arith.select %129, %30, %130 : vector<16x128xi1>, vector<16x128xi32>
    %cst_45 = arith.constant dense<2147483647> : vector<128xi32>
    %132 = vector.multi_reduction <minsi>, %131, %cst_45 [0] : vector<16x128xi32> to vector<128xi32>
    %133 = vector.shape_cast %132 : vector<128xi32> to vector<1x128xi32>
    %cst_46 = arith.constant dense<0x7F800000> : vector<128xf32>
    %134 = vector.multi_reduction <minimumf>, %125, %cst_46 [0] : vector<4x128xf32> to vector<128xf32>
    %135 = vector.shape_cast %134 : vector<128xf32> to vector<1x128xf32>
    %136 = vector.broadcast %135 : vector<1x128xf32> to vector<4x128xf32>
    %137 = arith.cmpf oeq, %125, %136 : vector<4x128xf32>
    %c4_i32_47 = arith.constant 4 : i32
    %138 = vector.broadcast %c4_i32_47 : i32 to vector<4x128xi32>
    %139 = arith.select %137, %31, %138 : vector<4x128xi1>, vector<4x128xi32>
    %cst_48 = arith.constant dense<2147483647> : vector<128xi32>
    %140 = vector.multi_reduction <minsi>, %139, %cst_48 [0] : vector<4x128xi32> to vector<128xi32>
    %141 = vector.shape_cast %140 : vector<128xi32> to vector<1x128xi32>
    %142 = vector.broadcast %141 : vector<1x128xi32> to vector<4x128xi32>
    %143 = arith.cmpi eq, %31, %142 : vector<4x128xi32>
    %c1073741824_i32_49 = arith.constant 1073741824 : i32
    %144 = vector.broadcast %c1073741824_i32_49 : i32 to vector<4x128xi32>
    %145 = arith.select %143, %35, %144 : vector<4x128xi1>, vector<4x128xi32>
    %cst_50 = arith.constant dense<2147483647> : vector<128xi32>
    %146 = vector.multi_reduction <minsi>, %145, %cst_50 [0] : vector<4x128xi32> to vector<128xi32>
    %147 = vector.shape_cast %146 : vector<128xi32> to vector<1x128xi32>
    %148 = arith.cmpf ole, %135, %127 : vector<1x128xf32>
    %149 = arith.select %148, %135, %127 : vector<1x128xi1>, vector<1x128xf32>
    %150 = vector.shape_cast %149 : vector<1x128xf32> to vector<128xf32>
    %c0_51 = arith.constant 0 : index
    %c2 = arith.constant 2 : index
    %c0_52 = arith.constant 0 : index
    %151 = vector.load %arg5[%c0_51, %c2, %c0_52] : memref<1x4x128xf32, #tpu.memory_space<vmem>>, vector<1x1x128xf32>
    %152 = vector.shape_cast %151 : vector<1x1x128xf32> to vector<128xf32>
    %153 = vector.shape_cast %150 : vector<128xf32> to vector<1x1x128xf32>
    tpu.vector_store %arg5[%c0_51, %c2, %c0_52], %153 {strides = array<i32>} : memref<1x4x128xf32, #tpu.memory_space<vmem>>, vector<1x1x128xf32>,
    %154 = arith.select %148, %147, %133 : vector<1x128xi1>, vector<1x128xi32>
    %155 = vector.shape_cast %154 : vector<1x128xi32> to vector<128xi32>
    %c0_53 = arith.constant 0 : index
    %c2_54 = arith.constant 2 : index
    %c0_55 = arith.constant 0 : index
    %156 = vector.load %arg6[%c0_53, %c2_54, %c0_55] : memref<1x4x128xi32, #tpu.memory_space<vmem>>, vector<1x1x128xi32>
    %157 = vector.shape_cast %156 : vector<1x1x128xi32> to vector<128xi32>
    %158 = vector.shape_cast %155 : vector<128xi32> to vector<1x1x128xi32>
    tpu.vector_store %arg6[%c0_53, %c2_54, %c0_55], %158 {strides = array<i32>} : memref<1x4x128xi32, #tpu.memory_space<vmem>>, vector<1x1x128xi32>,
    %c-1_i32_56 = arith.constant -1 : i32
    %159 = vector.broadcast %c-1_i32_56 : i32 to vector<1x128xi32>
    %160 = arith.select %148, %159, %133 : vector<1x128xi1>, vector<1x128xi32>
    %161 = vector.broadcast %160 : vector<1x128xi32> to vector<16x128xi32>
    %162 = arith.cmpi eq, %30, %161 : vector<16x128xi32>
    %cst_57 = arith.constant 0x7F800000 : f32
    %163 = vector.broadcast %cst_57 : f32 to vector<16x128xf32>
    %164 = arith.select %162, %163, %119 : vector<16x128xi1>, vector<16x128xf32>
    %c-1_i32_58 = arith.constant -1 : i32
    %165 = vector.broadcast %c-1_i32_58 : i32 to vector<1x128xi32>
    %166 = arith.select %148, %141, %165 : vector<1x128xi1>, vector<1x128xi32>
    %167 = vector.broadcast %166 : vector<1x128xi32> to vector<4x128xi32>
    %168 = arith.cmpi eq, %31, %167 : vector<4x128xi32>
    %cst_59 = arith.constant 0x7F800000 : f32
    %169 = vector.broadcast %cst_59 : f32 to vector<4x128xf32>
    %170 = arith.select %168, %169, %125 : vector<4x128xi1>, vector<4x128xf32>
    %cst_60 = arith.constant dense<0x7F800000> : vector<128xf32>
    %171 = vector.multi_reduction <minimumf>, %164, %cst_60 [0] : vector<16x128xf32> to vector<128xf32>
    %172 = vector.shape_cast %171 : vector<128xf32> to vector<1x128xf32>
    %173 = vector.broadcast %172 : vector<1x128xf32> to vector<16x128xf32>
    %174 = arith.cmpf oeq, %164, %173 : vector<16x128xf32>
    %c1073741824_i32_61 = arith.constant 1073741824 : i32
    %175 = vector.broadcast %c1073741824_i32_61 : i32 to vector<16x128xi32>
    %176 = arith.select %174, %30, %175 : vector<16x128xi1>, vector<16x128xi32>
    %cst_62 = arith.constant dense<2147483647> : vector<128xi32>
    %177 = vector.multi_reduction <minsi>, %176, %cst_62 [0] : vector<16x128xi32> to vector<128xi32>
    %178 = vector.shape_cast %177 : vector<128xi32> to vector<1x128xi32>
    %cst_63 = arith.constant dense<0x7F800000> : vector<128xf32>
    %179 = vector.multi_reduction <minimumf>, %170, %cst_63 [0] : vector<4x128xf32> to vector<128xf32>
    %180 = vector.shape_cast %179 : vector<128xf32> to vector<1x128xf32>
    %181 = vector.broadcast %180 : vector<1x128xf32> to vector<4x128xf32>
    %182 = arith.cmpf oeq, %170, %181 : vector<4x128xf32>
    %c4_i32_64 = arith.constant 4 : i32
    %183 = vector.broadcast %c4_i32_64 : i32 to vector<4x128xi32>
    %184 = arith.select %182, %31, %183 : vector<4x128xi1>, vector<4x128xi32>
    %cst_65 = arith.constant dense<2147483647> : vector<128xi32>
    %185 = vector.multi_reduction <minsi>, %184, %cst_65 [0] : vector<4x128xi32> to vector<128xi32>
    %186 = vector.shape_cast %185 : vector<128xi32> to vector<1x128xi32>
    %187 = vector.broadcast %186 : vector<1x128xi32> to vector<4x128xi32>
    %188 = arith.cmpi eq, %31, %187 : vector<4x128xi32>
    %c1073741824_i32_66 = arith.constant 1073741824 : i32
    %189 = vector.broadcast %c1073741824_i32_66 : i32 to vector<4x128xi32>
    %190 = arith.select %188, %35, %189 : vector<4x128xi1>, vector<4x128xi32>
    %cst_67 = arith.constant dense<2147483647> : vector<128xi32>
    %191 = vector.multi_reduction <minsi>, %190, %cst_67 [0] : vector<4x128xi32> to vector<128xi32>
    %192 = vector.shape_cast %191 : vector<128xi32> to vector<1x128xi32>
    %193 = arith.cmpf ole, %180, %172 : vector<1x128xf32>
    %194 = arith.select %193, %180, %172 : vector<1x128xi1>, vector<1x128xf32>
    %195 = vector.shape_cast %194 : vector<1x128xf32> to vector<128xf32>
    %c0_68 = arith.constant 0 : index
    %c3 = arith.constant 3 : index
    %c0_69 = arith.constant 0 : index
    %196 = vector.load %arg5[%c0_68, %c3, %c0_69] : memref<1x4x128xf32, #tpu.memory_space<vmem>>, vector<1x1x128xf32>
    %197 = vector.shape_cast %196 : vector<1x1x128xf32> to vector<128xf32>
    %198 = vector.shape_cast %195 : vector<128xf32> to vector<1x1x128xf32>
    tpu.vector_store %arg5[%c0_68, %c3, %c0_69], %198 {strides = array<i32>} : memref<1x4x128xf32, #tpu.memory_space<vmem>>, vector<1x1x128xf32>,
    %199 = arith.select %193, %192, %178 : vector<1x128xi1>, vector<1x128xi32>
    %200 = vector.shape_cast %199 : vector<1x128xi32> to vector<128xi32>
    %c0_70 = arith.constant 0 : index
    %c3_71 = arith.constant 3 : index
    %c0_72 = arith.constant 0 : index
    %201 = vector.load %arg6[%c0_70, %c3_71, %c0_72] : memref<1x4x128xi32, #tpu.memory_space<vmem>>, vector<1x1x128xi32>
    %202 = vector.shape_cast %201 : vector<1x1x128xi32> to vector<128xi32>
    %203 = vector.shape_cast %200 : vector<128xi32> to vector<1x1x128xi32>
    tpu.vector_store %arg6[%c0_70, %c3_71, %c0_72], %203 {strides = array<i32>} : memref<1x4x128xi32, #tpu.memory_space<vmem>>, vector<1x1x128xi32>,
    return
  }
  func.func @transform_0(%arg0: i32, %arg1: i32, %arg2: i32) -> (i32, i32, i32) {
    %c0_i32 = arith.constant 0 : i32
    %c0_i32_0 = arith.constant 0 : i32
    return %arg0, %c0_i32, %arg1 : i32, i32, i32
  }
  func.func @transform_1(%arg0: i32, %arg1: i32, %arg2: i32) -> (i32, i32, i32) {
    %c0_i32 = arith.constant 0 : i32
    %c0_i32_0 = arith.constant 0 : i32
    return %arg0, %arg2, %c0_i32 : i32, i32, i32
  }
  func.func @transform_2(%arg0: i32, %arg1: i32, %arg2: i32) -> (i32, i32, i32) {
    %c0_i32 = arith.constant 0 : i32
    %c0_i32_0 = arith.constant 0 : i32
    return %arg0, %c0_i32, %arg1 : i32, i32, i32
  }
  func.func @transform_3(%arg0: i32, %arg1: i32, %arg2: i32) -> (i32, i32, i32) {
    %c0_i32 = arith.constant 0 : i32
    %c0_i32_0 = arith.constant 0 : i32
    return %arg0, %c0_i32, %arg1 : i32, i32, i32
  }
}

</mosaic_0001>

<bundles_post_ra>
// kernel: tpu_custom_call.1
= control target key start
LH: loop header
LB: loop body
LE: loop exit
PB: predicated region body
PF: predicated region fallthrough
CT: control target
= control target key end

     0   :  { %9 = vsyncpa [#allocation3], 0  ;;  %s1221_s0 = inlined_call_operand.vmem [shape: f32[2,3,128], index: 0, kind: input, shape index: {}]   ;;  %s1222_s1 = inlined_call_operand.vmem [shape: f32[2,16,3], index: 1, kind: input, shape index: {}]   ;;  %s1223_s2 = inlined_call_operand.hbm [shape: f32[2,4,128], index: 2, kind: output, shape index: {0}]   ;;  %s1224_s3 = inlined_call_operand.hbm [shape: s32[2,4,128], index: 3, kind: output, shape index: {1}]  }
   0x1   :  { %11 = vsyncpa [#allocation3 + $0x1], 0 }
   0x2   :  { %12 = vsyncpa [#allocation5], 0 }
   0x3   :  { %14 = vsyncpa [#allocation5 + $0x1], 0  ;;  %s951_s12 = smov 0   ;;  %s953_s13 = smov 0  }
   0x4   :  { %s955_s14 = smov 0   ;;  %s957_s15 = smov 0  }
   0x5   :  { %s959_s16 = smov 0   ;;  %s961_s17 = smov 0  }
   0x6 LB: > { %s730_s18 = sadd.s32 4294967295, %s925_s17   ;;  %s731_s19 = sadd.s32 4294967294, %s925_s17   ;;  %s925_s17 = sphi %s961_s17, %s20_s17   ;;  %s921_s16 = sphi %s959_s16, %s1231_s16   ;;  %s917_s15 = sphi %s957_s15, %s1230_s15   ;;  %s913_s14 = sphi %s955_s14, %s1229_s14   ;;  %s909_s13 = sphi %s953_s13, %s1228_s13   ;;  %s905_s12 = sphi %s951_s12, %s1227_s12  }
   0x7   : > { %s39_s20 = sadd.s32 1, %s921_s16  ;;  %s104_s21 = sadd.s32 1, %s913_s14 }
   0x8   : > { %p41_p0 = scmp.ge.s32.totalorder %s39_s20, 2  ;;  %p114_p1 = scmp.ne.s32.totalorder %s913_s14, %s909_s13 }
   0x9   : > { %p115_p2 = scmp.eq.s32.totalorder %s730_s18, 1  ;;  %p120_p3 = scmp.ne.s32.totalorder %s909_s13, %s905_s12 }
   0xa   : > { %s1233_s20 = smov (%p41_p0, %s39_s20), 0  ;;  %p121_p5 = scmp.eq.s32.totalorder %s731_s19, 1 }
   0xb   : > { %p991_p4 = por %p115_p2, %p114_p1  ;;  %s99_s23 = ssub.s32 %s921_s16, %s1233_s20 }
   0xc   : > { %p734_p6 = scmp.ge.s32.totalorder %s925_s17, 1  ;;  %p102_p7 = scmp.eq.s32.totalorder %s99_s23, 0 }
   0xd   : > { %p998_p8 = por %p121_p5, %p120_p3  ;;  %p190_p9 = scmp.lt.s32.totalorder %s925_s17, 3 }
   0xe   : > { %s1004_s25 = scalar_select %p102_p7, %s913_s14, %s104_s21  }
   0xf   : > { %p191_p10 = pnand %p734_p6, %p190_p9 }
  0x10   : > { %s1007_s26 = sand.u32 (!%p191_p10), 1, %s909_s13   ;;  %p230_p11 = scmp.lt.s32.totalorder (!%p191_p10), %s917_s15, 1 }
  0x11   : > { %194 = sbr.rel (%p191_p10) target bundleno = 292 (0x124), region = 28  ;;  %s735_s27 = sshll.u32 (!%p191_p10), %s1007_s26, 2 }
  0x12   : > { %s1011_s28 = scalar_lea.vmem (!%p191_p10), [#allocation2], %s735_s27  ;;  %s1017_s30 = scalar_lea.vmem (!%p191_p10), [#allocation4], %s735_s27 }
  0x13   : > { %s742_s18 = sshll.u32 (!%p191_p10), %s917_s15, 2  ;;  %s586_s27 = sshll.u32 (!%p191_p10), %s1011_s28, 4  ;;  %s587_s27 = int_to_ptr.vmem [resolvable:$true] %s586_s27 }
  0x14   : > { %s584_s23 = scalar_lea.hbm (!%p191_p10), %s1223_s2, %s742_s18  ;;  %s835_s9 = scalar_lea.hbm (!%p191_p10), %s1223_s2, 8 }
  0x16   : > { %v927_v0 = vmov 1   ;;  %v928_v1 = vmov 0   ;;  %v929_v2 = vmov 2   ;;  %v930_v3 = vmov inf   ;;  %s1015_s29 = scalar_select %p230_p11, %s917_s15, 1 }
  0x17   : > { %812 = vset.pattern.permute.xlu1 %v927_v0  ;;  %811 = vset.pattern.permute.xlu0 %v928_v1  ;;  %251 = vst [vmem:[%s1011_s28] sm:$0xf] %v930_v3  ;;  %vm332_vm0 = vcmask 1043456   ;;  %v301_v11 = vlaneseq }
  0x18   : > { %813 = vset.pattern.permute.xlu2 %v929_v2  ;;  %252 = vst [vmem:[%s1017_s30] sm:$0xf] %v928_v1  ;;  %s746_s4 = sshll.u32 %s1015_s29, 4  ;;  %s737_s8 = sshll.u32 %s1015_s29, 2 }
  0x19   : > { %s245_s7 = scalar_lea.vmem %s1222_s1, %s746_s4  ;;  %v1029_v14 = vshrl.u32 %v301_v11, 7  ;;  %s236_s11 = scalar_lea.vmem %s1221_s0, %s737_s8 }
  0x1a   : > { %v254_v4 = vld [vmem:[%s245_s7] sm:$0xff]  ;;  %v255_v5 = vld [vmem:[%s245_s7 + $0x8] sm:$0xff]  ;;  %s588_s29 = sshll.u32 %s584_s23, 4  ;;  %s568_s4 = scalar_lea.sflag [#allocation3], %s1007_s26  ;;  %s589_s29 = int_to_ptr.hbm [resolvable:$true] %s588_s29 }
  0x1b   : > { %272 = vperm.xlu1 %812, %v254_v4   ;;  %258 = vperm.xlu0 %811, %v254_v4   ;;  %v253_v23 = vld [vmem:[%s236_s11] sm:$0x7]  ;;  %v1048_v62 = vadd.s32 8, %v1029_v14  ;;  %s829_s5 = sshra.s32 %s589_s29, 4  ;;  %s830_s5 = int_to_ptr.hbm [resolvable:$true] %s829_s5 }
  0x1c   : > { %287 = vperm.xlu2 %813, %v254_v4   ;;  %v279_v25 = vperm.slane %v253_v23, 1  ;;  %v266_v26 = vperm.slane %v253_v23, 0  ;;  %v294_v29 = vperm.slane %v253_v23, 2  ;;  %s831_s6 = scalar_lea.hbm %s830_s5, 4  ;;  %p836_p1 = scmp.lt.s32.totalorder %s830_s5, %s1223_s2 }
  0x1d   : > { %p832_p12 = scmp.ne.s32.totalorder %s830_s5, %s831_s6  ;;  %p837_p2 = scmp.lt.s32.totalorder %s835_s9, %s831_s6 }
  0x1e   : > { %v1025_v6 = vld [vmem:[%s1011_s28] sm:$0xf] }
  0x1f   : > { %v333_v7 = vsel %vm332_vm0, %v1025_v6, inf  ;;  %v1042_v37 = vld [vmem:[%s1017_s30] sm:$0xf]  ;;  %p833_p13 = pnand %p832_p12, %p991_p4  ;;  %p838_p3 = por %p837_p2, %p836_p1 }
  0x20   : > { %v334_v8 = vrot.slane %v333_v7, 4 }
  0x21   : > { %p834_p0 = pneg %p833_p13 }
  0x22   : > { %v335_v9 = vmin.f32 %v333_v7, %v334_v8 }
  0x23   : > { %276 = vperm.xlu1 %812, %v255_v5   ;;  %263 = vperm.xlu0 %811, %v255_v5   ;;  %p839_p5 = pnand %p838_p3, %p834_p0 }
  0x24   : > { %291 = vperm.xlu2 %813, %v255_v5   ;;  %v336_v10 = vrot.slane %v335_v9, 2 }
  0x26   : > { %v337_v12 = vmin.f32 %v335_v9, %v336_v10 }
  0x28   : > { %v338_v13 = vrot.slane %v337_v12, 1 }
  0x2a   : > { %v1031_v15 = vmin.f32 %v337_v12, %v338_v13 }
  0x2b   : > { %814 = vset.pattern.permute.xlu0 %v929_v2 }
  0x2c   : > { %vm340_vm1 = vcmp.eq.f32.partialorder %v1025_v6, %v1031_v15 }
  0x2d   : > { %v341_v16 = vsel %vm340_vm1, %v1029_v14, 4 }
  0x2e   : > { %v342_v17 = vsel %vm332_vm0, %v341_v16, 2147483647 }
  0x2f   : > { %v343_v18 = vrot.slane %v342_v17, 4 }
  0x31   : > { %vm344_vm2 = vcmp.lt.s32.totalorder %v342_v17, %v343_v18 }
  0x32   : > { %v345_v19 = vsel %vm344_vm2, %v342_v17, %v343_v18 }
  0x33   : > { %v346_v20 = vrot.slane %v345_v19, 2 }
  0x35   : > { %vm347_vm3 = vcmp.lt.s32.totalorder %v345_v19, %v346_v20 }
  0x36   : > { %v348_v21 = vsel %vm347_vm3, %v345_v19, %v346_v20 }
  0x37   : > { %v349_v24 = vrot.slane %v348_v21, 1 }
  0x39   : > { %vm350_vm4 = vcmp.lt.s32.totalorder %v348_v21, %v349_v24 }
  0x3a   : > { %v351_v32 = vsel %vm350_vm4, %v348_v21, %v349_v24 }
  0x3b   : > { %vm352_vm5 = vcmp.eq.s32.totalorder %v1029_v14, %v351_v32 }
  0x3c   : > { %v353_v47 = vsel %vm352_vm5, %v1042_v37, 1073741824 }
  0x3d   : > { %v354_v50 = vsel %vm332_vm0, %v353_v47, 2147483647 }
  0x3e   : > { %v355_v54 = vrot.slane %v354_v50, 4 }
  0x40   : > { %vm356_vm6 = vcmp.lt.s32.totalorder %v354_v50, %v355_v54 }
  0x41   : > { %v357_v58 = vsel %vm356_vm6, %v354_v50, %v355_v54 }
  0x42   : > { %v358_v61 = vrot.slane %v357_v58, 2 }
  0x44   : > { %vm359_vm9 = vcmp.lt.s32.totalorder %v357_v58, %v358_v61 }
  0x45   : > { %v360_v5 = vsel %vm359_vm9, %v357_v58, %v358_v61 }
  0x46   : > { %v361_v11 = vrot.slane %v360_v5, 1 }
  0x48   : > { %vm362_vm15 = vcmp.lt.s32.totalorder %v360_v5, %v361_v11 }
  0x49   : > { %v363_v21 = vsel %vm362_vm15, %v360_v5, %v361_v11 }
  0x76   : > { %v288_v22 = vpop.permute.xlu2 %287 }
  0x77   : > { %v295_v33 = vsub.f32 %v288_v22, %v294_v29 }
  0x79   : > { %v297_v43 = vmul.f32 %v295_v33, %v295_v33 }
  0x7e   : > { %v292_v34 = vpop.permute.xlu2 %291 }
  0x7f   : > { %v296_v40 = vsub.f32 %v292_v34, %v294_v29 }
  0x81   : > { %v298_v48 = vmul.f32 %v296_v40, %v296_v40 }
  0x8d   : > { %v273_v27 = vpop.permute.xlu1 %272  ;;  %v259_v28 = vpop.permute.xlu0 %258 }
  0x8e   : > { %v280_v30 = vsub.f32 %v273_v27, %v279_v25  ;;  %v267_v31 = vsub.f32 %v259_v28, %v266_v26 }
  0x90   : > { %v282_v35 = vmul.f32 %v280_v30, %v280_v30  ;;  %v269_v36 = vmul.f32 %v267_v31, %v267_v31 }
  0x92   : > { %v284_v44 = vadd.f32 %v282_v35, %v269_v36 }
  0x94   : > { %v299_v51 = vadd.f32 %v297_v43, %v284_v44 }
  0x95   : > { %v277_v38 = vpop.permute.xlu1 %276  ;;  %v264_v39 = vpop.permute.xlu0 %263 }
  0x96   : > { %v281_v41 = vsub.f32 %v277_v38, %v279_v25  ;;  %v268_v42 = vsub.f32 %v264_v39, %v266_v26 }
  0x98   : > { %v283_v45 = vmul.f32 %v281_v41, %v281_v41  ;;  %v270_v46 = vmul.f32 %v268_v42, %v268_v42 }
  0x9a   : > { %v285_v49 = vadd.f32 %v283_v45, %v270_v46 }
  0x9c   : > { %v300_v52 = vadd.f32 %v298_v48, %v285_v49 }
  0x9e   : > { %v310_v53 = vmin.f32 %v299_v51, %v300_v52 }
  0xa0   : > { %v311_v55 = vrot.slane %v310_v53, 4 }
  0xa2   : > { %v312_v56 = vmin.f32 %v310_v53, %v311_v55 }
  0xa4   : > { %v313_v57 = vrot.slane %v312_v56, 2 }
  0xa6   : > { %v314_v59 = vmin.f32 %v312_v56, %v313_v57 }
  0xa8   : > { %v315_v60 = vrot.slane %v314_v59, 1 }
  0xaa   : > { %v316_v63 = vmin.f32 %v314_v59, %v315_v60 }
  0xac   : > { %vm317_vm7 = vcmp.eq.f32.partialorder %v299_v51, %v316_v63  ;;  %vm318_vm8 = vcmp.eq.f32.partialorder %v300_v52, %v316_v63  ;;  %vm364_vm10 = vcmp.le.f32.partialorder %v1031_v15, %v316_v63 }
  0xad   : > { %v319_v0 = vsel %vm317_vm7, %v1029_v14, 1073741824  ;;  %v320_v1 = vsel %vm318_vm8, %v1048_v62, 1073741824  ;;  %v374_v2 = vsel %vm364_vm10, %v351_v32, 4294967295  ;;  %v365_v3 = vsel %vm364_vm10, %v1031_v15, %v316_v63 }
  0xae   : > { %vm321_vm11 = vcmp.lt.s32.totalorder %v319_v0, %v320_v1  ;;  %vm375_vm12 = vcmp.eq.s32.totalorder %v1029_v14, %v374_v2  ;;  %366 = vst [vmem:[%s1011_s28] sm:$0x1] %v365_v3 }
  0xaf   : > { %v322_v4 = vsel %vm321_vm11, %v319_v0, %v320_v1  ;;  %v376_v7 = vsel %vm375_vm12, inf, %v1025_v6 }
  0xb0   : > { %v323_v8 = vrot.slane %v322_v4, 4  ;;  %v399_v9 = vsel %vm332_vm0, %v376_v7, inf }
  0xb1   : > { %v400_v10 = vrot.slane %v399_v9, 4 }
  0xb2   : > { %vm324_vm13 = vcmp.lt.s32.totalorder %v322_v4, %v323_v8 }
  0xb3   : > { %v325_v12 = vsel %vm324_vm13, %v322_v4, %v323_v8  ;;  %v401_v13 = vmin.f32 %v399_v9, %v400_v10 }
  0xb4   : > { %v326_v16 = vrot.slane %v325_v12, 2 }
  0xb5   : > { %v402_v17 = vrot.slane %v401_v13, 2 }
  0xb6   : > { %vm327_vm14 = vcmp.lt.s32.totalorder %v325_v12, %v326_v16 }
  0xb7   : > { %v328_v18 = vsel %vm327_vm14, %v325_v12, %v326_v16  ;;  %v403_v19 = vmin.f32 %v401_v13, %v402_v17 }
  0xb8   : > { %v329_v20 = vrot.slane %v328_v18, 1 }
  0xb9   : > { %v404_v22 = vrot.slane %v403_v19, 1 }
  0xba   : > { %vm330_vm1 = vcmp.lt.s32.totalorder %v328_v18, %v329_v20 }
  0xbb   : > { %v331_v6 = vsel %vm330_vm1, %v328_v18, %v329_v20  ;;  %v1062_v23 = vmin.f32 %v403_v19, %v404_v22 }
  0xbc   : > { %v367_v24 = vsel %vm364_vm10, %v363_v21, %v331_v6  ;;  %v369_v25 = vsel %vm364_vm10, 4294967295, %v331_v6 }
  0xbd   : > { %vm370_vm2 = vcmp.eq.s32.totalorder %v1029_v14, %v369_v25  ;;  %vm371_vm3 = vcmp.eq.s32.totalorder %v1048_v62, %v369_v25  ;;  %vm406_vm4 = vcmp.eq.f32.partialorder %v376_v7, %v1062_v23  ;;  %368 = vst [vmem:[%s1017_s30] sm:$0x1] %v367_v24 }
  0xbe   : > { %v1072_v26 = vsel %vm370_vm2, inf, %v299_v51  ;;  %v1074_v27 = vsel %vm371_vm3, inf, %v300_v52  ;;  %v407_v28 = vsel %vm406_vm4, %v1029_v14, 4 }
  0xbf   : > { %v377_v29 = vmin.f32 %v1072_v26, %v1074_v27  ;;  %v408_v30 = vsel %vm332_vm0, %v407_v28, 2147483647 }
  0xc0   : > { %v409_v15 = vrot.slane %v408_v30, 4 }
  0xc1   : > { %v378_v31 = vrot.slane %v377_v29, 4 }
  0xc2   : > { %vm410_vm5 = vcmp.lt.s32.totalorder %v408_v30, %v409_v15 }
  0xc3   : > { %v379_v32 = vmin.f32 %v377_v29, %v378_v31  ;;  %v411_v33 = vsel %vm410_vm5, %v408_v30, %v409_v15 }
  0xc4   : > { %v412_v34 = vrot.slane %v411_v33, 2 }
  0xc5   : > { %v380_v35 = vrot.slane %v379_v32, 2 }
  0xc6   : > { %vm413_vm6 = vcmp.lt.s32.totalorder %v411_v33, %v412_v34 }
  0xc7   : > { %v381_v36 = vmin.f32 %v379_v32, %v380_v35  ;;  %v414_v38 = vsel %vm413_vm6, %v411_v33, %v412_v34 }
  0xc8   : > { %v415_v39 = vrot.slane %v414_v38, 1 }
  0xc9   : > { %v382_v40 = vrot.slane %v381_v36, 1 }
  0xca   : > { %vm416_vm7 = vcmp.lt.s32.totalorder %v414_v38, %v415_v39 }
  0xcb   : > { %v383_v41 = vmin.f32 %v381_v36, %v382_v40  ;;  %v417_v42 = vsel %vm416_vm7, %v414_v38, %v415_v39 }
  0xcc   : > { %vm418_vm8 = vcmp.eq.s32.totalorder %v1029_v14, %v417_v42 }
  0xcd   : > { %vm384_vm9 = vcmp.eq.f32.partialorder %v1072_v26, %v383_v41  ;;  %vm385_vm10 = vcmp.eq.f32.partialorder %v1074_v27, %v383_v41  ;;  %v419_v43 = vsel %vm418_vm8, %v1042_v37, 1073741824  ;;  %vm430_vm11 = vcmp.le.f32.partialorder %v1062_v23, %v383_v41 }
  0xce   : > { %v386_v44 = vsel %vm384_vm9, %v1029_v14, 1073741824  ;;  %v387_v45 = vsel %vm385_vm10, %v1048_v62, 1073741824  ;;  %v440_v46 = vsel %vm430_vm11, %v417_v42, 4294967295  ;;  %v431_v47 = vsel %vm430_vm11, %v1062_v23, %v383_v41 }
  0xcf   : > { %vm388_vm12 = vcmp.lt.s32.totalorder %v386_v44, %v387_v45  ;;  %vm441_vm13 = vcmp.eq.s32.totalorder %v1029_v14, %v440_v46  ;;  %432 = vst [vmem:[%s1011_s28 + $0x1] sm:$0x1] %v431_v47  ;;  %v420_v48 = vsel %vm332_vm0, %v419_v43, 2147483647 }
  0xd0   : > { %v389_v49 = vsel %vm388_vm12, %v386_v44, %v387_v45  ;;  %v1095_v50 = vsel %vm441_vm13, inf, %v376_v7  ;;  %v421_v51 = vrot.slane %v420_v48, 4 }
  0xd1   : > { %v390_v52 = vrot.slane %v389_v49, 4  ;;  %v465_v53 = vsel %vm332_vm0, %v1095_v50, inf }
  0xd2   : > { %v466_v54 = vrot.slane %v465_v53, 4  ;;  %vm422_vm14 = vcmp.lt.s32.totalorder %v420_v48, %v421_v51 }
  0xd3   : > { %vm391_vm15 = vcmp.lt.s32.totalorder %v389_v49, %v390_v52  ;;  %v423_v55 = vsel %vm422_vm14, %v420_v48, %v421_v51 }
  0xd4   : > { %v392_v56 = vsel %vm391_vm15, %v389_v49, %v390_v52  ;;  %v467_v57 = vmin.f32 %v465_v53, %v466_v54  ;;  %v424_v58 = vrot.slane %v423_v55, 2 }
  0xd5   : > { %v393_v59 = vrot.slane %v392_v56, 2 }
  0xd6   : > { %v468_v60 = vrot.slane %v467_v57, 2  ;;  %vm425_vm1 = vcmp.lt.s32.totalorder %v423_v55, %v424_v58 }
  0xd7   : > { %vm394_vm2 = vcmp.lt.s32.totalorder %v392_v56, %v393_v59  ;;  %v426_v61 = vsel %vm425_vm1, %v423_v55, %v424_v58 }
  0xd8   : > { %v395_v63 = vsel %vm394_vm2, %v392_v56, %v393_v59  ;;  %v469_v0 = vmin.f32 %v467_v57, %v468_v60  ;;  %v427_v1 = vrot.slane %v426_v61, 1 }
  0xd9   : > { %v396_v2 = vrot.slane %v395_v63, 1 }
  0xda   : > { %v470_v3 = vrot.slane %v469_v0, 1  ;;  %vm428_vm3 = vcmp.lt.s32.totalorder %v426_v61, %v427_v1 }
  0xdb   : > { %vm397_vm4 = vcmp.lt.s32.totalorder %v395_v63, %v396_v2  ;;  %v429_v7 = vsel %vm428_vm3, %v426_v61, %v427_v1 }
  0xdc   : > { %v398_v4 = vsel %vm397_vm4, %v395_v63, %v396_v2  ;;  %v1099_v5 = vmin.f32 %v469_v0, %v470_v3 }
  0xdd   : > { %v435_v8 = vsel %vm430_vm11, 4294967295, %v398_v4  ;;  %v433_v9 = vsel %vm430_vm11, %v429_v7, %v398_v4 }
  0xde   : > { %vm436_vm5 = vcmp.eq.s32.totalorder %v1029_v14, %v435_v8  ;;  %vm437_vm6 = vcmp.eq.s32.totalorder %v1048_v62, %v435_v8  ;;  %vm472_vm7 = vcmp.eq.f32.partialorder %v1095_v50, %v1099_v5  ;;  %434 = vst [vmem:[%s1017_s30 + $0x1] sm:$0x1] %v433_v9 }
  0xdf   : > { %v1111_v10 = vsel %vm436_vm5, inf, %v1072_v26  ;;  %v1114_v11 = vsel %vm437_vm6, inf, %v1074_v27  ;;  %v473_v12 = vsel %vm472_vm7, %v1029_v14, 4 }
  0xe0   : > { %v443_v13 = vmin.f32 %v1111_v10, %v1114_v11  ;;  %v474_v16 = vsel %vm332_vm0, %v473_v12, 2147483647 }
  0xe1   : > { %v475_v17 = vrot.slane %v474_v16, 4 }
  0xe2   : > { %v444_v18 = vrot.slane %v443_v13, 4 }
  0xe3   : > { %vm476_vm8 = vcmp.lt.s32.totalorder %v474_v16, %v475_v17 }
  0xe4   : > { %v445_v19 = vmin.f32 %v443_v13, %v444_v18  ;;  %v477_v20 = vsel %vm476_vm8, %v474_v16, %v475_v17 }
  0xe5   : > { %v478_v21 = vrot.slane %v477_v20, 2 }
  0xe6   : > { %v446_v22 = vrot.slane %v445_v19, 2 }
  0xe7   : > { %vm479_vm9 = vcmp.lt.s32.totalorder %v477_v20, %v478_v21 }
  0xe8   : > { %v447_v6 = vmin.f32 %v445_v19, %v446_v22  ;;  %v480_v23 = vsel %vm479_vm9, %v477_v20, %v478_v21 }
  0xe9   : > { %v481_v24 = vrot.slane %v480_v23, 1 }
  0xea   : > { %v448_v25 = vrot.slane %v447_v6, 1 }
  0xeb   : > { %vm482_vm10 = vcmp.lt.s32.totalorder %v480_v23, %v481_v24 }
  0xec   : > { %v449_v26 = vmin.f32 %v447_v6, %v448_v25  ;;  %v483_v27 = vsel %vm482_vm10, %v480_v23, %v481_v24 }
  0xed   : > { %vm484_vm11 = vcmp.eq.s32.totalorder %v1029_v14, %v483_v27 }
  0xee   : > { %vm450_vm12 = vcmp.eq.f32.partialorder %v1111_v10, %v449_v26  ;;  %vm451_vm13 = vcmp.eq.f32.partialorder %v1114_v11, %v449_v26  ;;  %vm496_vm14 = vcmp.le.f32.partialorder %v1099_v5, %v449_v26  ;;  %v485_v28 = vsel %vm484_vm11, %v1042_v37, 1073741824 }
  0xef   : > { %v452_v29 = vsel %vm450_vm12, %v1029_v14, 1073741824  ;;  %v453_v30 = vsel %vm451_vm13, %v1048_v62, 1073741824  ;;  %v506_v15 = vsel %vm496_vm14, %v483_v27, 4294967295  ;;  %v497_v31 = vsel %vm496_vm14, %v1099_v5, %v449_v26 }
  0xf0   : > { %vm454_vm15 = vcmp.lt.s32.totalorder %v452_v29, %v453_v30  ;;  %vm507_vm1 = vcmp.eq.s32.totalorder %v1029_v14, %v506_v15  ;;  %498 = vst [vmem:[%s1011_s28 + $0x2] sm:$0x1] %v497_v31  ;;  %v486_v32 = vsel %vm332_vm0, %v485_v28, 2147483647 }
  0xf1   : > { %v455_v33 = vsel %vm454_vm15, %v452_v29, %v453_v30  ;;  %v508_v34 = vsel %vm507_vm1, inf, %v1095_v50  ;;  %v487_v35 = vrot.slane %v486_v32, 4 }
  0xf2   : > { %v456_v36 = vrot.slane %v455_v33, 4  ;;  %v531_v38 = vsel %vm332_vm0, %v508_v34, inf }
  0xf3   : > { %v532_v39 = vrot.slane %v531_v38, 4  ;;  %vm488_vm2 = vcmp.lt.s32.totalorder %v486_v32, %v487_v35 }
  0xf4   : > { %vm457_vm3 = vcmp.lt.s32.totalorder %v455_v33, %v456_v36  ;;  %v489_v40 = vsel %vm488_vm2, %v486_v32, %v487_v35 }
  0xf5   : > { %v458_v41 = vsel %vm457_vm3, %v455_v33, %v456_v36  ;;  %v533_v42 = vmin.f32 %v531_v38, %v532_v39  ;;  %v490_v43 = vrot.slane %v489_v40, 2 }
  0xf6   : > { %v459_v44 = vrot.slane %v458_v41, 2 }
  0xf7   : > { %v534_v45 = vrot.slane %v533_v42, 2  ;;  %vm491_vm4 = vcmp.lt.s32.totalorder %v489_v40, %v490_v43 }
  0xf8   : > { %vm460_vm5 = vcmp.lt.s32.totalorder %v458_v41, %v459_v44  ;;  %v492_v46 = vsel %vm491_vm4, %v489_v40, %v490_v43 }
  0xf9   : > { %v461_v47 = vsel %vm460_vm5, %v458_v41, %v459_v44  ;;  %v535_v48 = vmin.f32 %v533_v42, %v534_v45  ;;  %v493_v49 = vrot.slane %v492_v46, 1 }
  0xfa   : > { %v462_v50 = vrot.slane %v461_v47, 1 }
  0xfb   : > { %v536_v51 = vrot.slane %v535_v48, 1  ;;  %vm494_vm6 = vcmp.lt.s32.totalorder %v492_v46, %v493_v49 }
  0xfc   : > { %vm463_vm7 = vcmp.lt.s32.totalorder %v461_v47, %v462_v50  ;;  %v495_v54 = vsel %vm494_vm6, %v492_v46, %v493_v49 }
  0xfd   : > { %v464_v52 = vsel %vm463_vm7, %v461_v47, %v462_v50  ;;  %v1137_v53 = vmin.f32 %v535_v48, %v536_v51 }
  0xfe   : > { %v501_v55 = vsel %vm496_vm14, 4294967295, %v464_v52  ;;  %v499_v56 = vsel %vm496_vm14, %v495_v54, %v464_v52 }
  0xff   : > { %vm502_vm8 = vcmp.eq.s32.totalorder %v1029_v14, %v501_v55  ;;  %vm503_vm9 = vcmp.eq.s32.totalorder %v1048_v62, %v501_v55  ;;  %vm538_vm10 = vcmp.eq.f32.partialorder %v508_v34, %v1137_v53  ;;  %500 = vst [vmem:[%s1017_s30 + $0x2] sm:$0x1] %v499_v56 }
 0x100   : > { %v504_v57 = vsel %vm502_vm8, inf, %v1111_v10  ;;  %v505_v58 = vsel %vm503_vm9, inf, %v1114_v11  ;;  %v539_v59 = vsel %vm538_vm10, %v1029_v14, 4 }
 0x101   : > { %v509_v60 = vmin.f32 %v504_v57, %v505_v58  ;;  %v540_v61 = vsel %vm332_vm0, %v539_v59, 2147483647 }
 0x102   : > { %v541_v63 = vrot.slane %v540_v61, 4 }
 0x103   : > { %v510_v0 = vrot.slane %v509_v60, 4 }
 0x104   : > { %vm542_vm11 = vcmp.lt.s32.totalorder %v540_v61, %v541_v63 }
 0x105   : > { %v511_v1 = vmin.f32 %v509_v60, %v510_v0  ;;  %v543_v2 = vsel %vm542_vm11, %v540_v61, %v541_v63 }
 0x106   : > { %v544_v3 = vrot.slane %v543_v2, 2 }
 0x107   : > { %v512_v4 = vrot.slane %v511_v1, 2 }
 0x108   : > { %vm545_vm12 = vcmp.lt.s32.totalorder %v543_v2, %v544_v3 }
 0x109   : > { %v513_v5 = vmin.f32 %v511_v1, %v512_v4  ;;  %v546_v7 = vsel %vm545_vm12, %v543_v2, %v544_v3 }
 0x10a   : > { %v547_v8 = vrot.slane %v546_v7, 1 }
 0x10b   : > { %v514_v9 = vrot.slane %v513_v5, 1 }
 0x10c   : > { %vm548_vm13 = vcmp.lt.s32.totalorder %v546_v7, %v547_v8 }
 0x10d   : > { %v515_v10 = vmin.f32 %v513_v5, %v514_v9  ;;  %v549_v11 = vsel %vm548_vm13, %v546_v7, %v547_v8 }
 0x10e   : > { %vm550_vm14 = vcmp.eq.s32.totalorder %v1029_v14, %v549_v11 }
 0x10f   : > { %vm516_vm15 = vcmp.eq.f32.partialorder %v504_v57, %v515_v10  ;;  %vm517_vm1 = vcmp.eq.f32.partialorder %v505_v58, %v515_v10  ;;  %vm562_vm2 = vcmp.le.f32.partialorder %v1137_v53, %v515_v10  ;;  %v551_v12 = vsel %vm550_vm14, %v1042_v37, 1073741824 }
 0x110   : > { %v518_v13 = vsel %vm516_vm15, %v1029_v14, 1073741824  ;;  %v519_v16 = vsel %vm517_vm1, %v1048_v62, 1073741824  ;;  %v563_v17 = vsel %vm562_vm2, %v1137_v53, %v515_v10  ;;  %v552_v18 = vsel %vm332_vm0, %v551_v12, 2147483647 }
 0x111   : > { %vm520_vm3 = vcmp.lt.s32.totalorder %v518_v13, %v519_v16  ;;  %564 = vst [vmem:[%s1011_s28 + $0x3] sm:$0x1] %v563_v17  ;;  %v553_v19 = vrot.slane %v552_v18, 4 }
 0x112   : > { %v521_v20 = vsel %vm520_vm3, %v518_v13, %v519_v16 }
 0x113   : > { %842 = shalt.err (!%p839_p5)
}
 0x114   : > { %747 = dma.vmem_to_hbm [thread:$0]  (%p991_p4), %s587_s27, 64, %s589_s29, %s568_s4   ;;  %v522_v14 = vrot.slane %v521_v20, 4  ;;  %vm554_vm0 = vcmp.lt.s32.totalorder %v552_v18, %v553_v19 }
 0x115   : > { %v555_v37 = vsel %vm554_vm0, %v552_v18, %v553_v19  ;;  %s599_s21 = scalar_lea.hbm %s1224_s3, %s742_s18  ;;  %s601_s23 = sshll.u32 %s1017_s30, 4  ;;  %s602_s23 = int_to_ptr.vmem [resolvable:$true] %s601_s23 }
 0x116   : > { %vm523_vm4 = vcmp.lt.s32.totalorder %v521_v20, %v522_v14  ;;  %v556_v62 = vrot.slane %v555_v37, 2  ;;  %s603_s27 = sshll.u32 %s599_s21, 4  ;;  %s573_s15 = scalar_lea.sflag [#allocation5], %s1007_s26  ;;  %s604_s27 = int_to_ptr.hbm [resolvable:$true] %s603_s27 }
 0x117   : > { %v524_v21 = vsel %vm523_vm4, %v521_v20, %v522_v14  ;;  %s857_s29 = sshra.s32 %s604_s27, 4  ;;  %s863_s6 = scalar_lea.hbm %s1224_s3, 8  ;;  %s858_s29 = int_to_ptr.hbm [resolvable:$true] %s857_s29 }
 0x118   : > { %v525_v22 = vrot.slane %v524_v21, 2  ;;  %vm557_vm5 = vcmp.lt.s32.totalorder %v555_v37, %v556_v62  ;;  %s859_s18 = scalar_lea.hbm %s858_s29, 4  ;;  %p864_p10 = scmp.lt.s32.totalorder %s858_s29, %s1224_s3 }
 0x119   : > { %v558_v6 = vsel %vm557_vm5, %v555_v37, %v556_v62  ;;  %p860_p6 = scmp.ne.s32.totalorder %s858_s29, %s859_s18  ;;  %p865_p11 = scmp.lt.s32.totalorder %s863_s6, %s859_s18 }
 0x11a   : > { %vm526_vm6 = vcmp.lt.s32.totalorder %v524_v21, %v525_v22  ;;  %v559_v23 = vrot.slane %v558_v6, 1 }
 0x11b   : > { %v527_v24 = vsel %vm526_vm6, %v524_v21, %v525_v22  ;;  %p861_p7 = pnand %p860_p6, %p991_p4  ;;  %p866_p12 = por %p865_p11, %p864_p10 }
 0x11c   : > { %v528_v25 = vrot.slane %v527_v24, 1  ;;  %vm560_vm7 = vcmp.lt.s32.totalorder %v558_v6, %v559_v23 }
 0x11d   : > { %v561_v27 = vsel %vm560_vm7, %v558_v6, %v559_v23  ;;  %p862_p9 = pneg %p861_p7 }
 0x11e   : > { %vm529_vm8 = vcmp.lt.s32.totalorder %v527_v24, %v528_v25 }
 0x11f   : > { %v530_v26 = vsel %vm529_vm8, %v527_v24, %v528_v25  ;;  %p867_p13 = pnand %p866_p12, %p862_p9 }
 0x120   : > { %v565_v28 = vsel %vm562_vm2, %v561_v27, %v530_v26 }
 0x121   : > { %566 = vst [vmem:[%s1017_s30 + $0x3] sm:$0x1] %v565_v28 }
 0x122   : > { %870 = shalt.err (!%p867_p13)
}
 0x123   : > { %748 = dma.vmem_to_hbm [thread:$0]  (%p991_p4), %s602_s23, 64, %s604_s27, %s573_s15  }
 0x124 PF: > { %p758_p0 = scmp.ge.s32.totalorder %s925_s17, 2  ;;  %s615_s26 = sand.u32 1, %s905_s12  }
 0x125   : > { %s616_s30 = scalar_lea.sflag [#allocation3], %s615_s26 }
 0x126   : > { %p752_p1 = pnand %p758_p0, %p998_p8 }
 0x128   : > { %p753_p2 = pneg %p752_p1 }
 0x12a   : > { %896 = dma.done.wait (%p753_p2), %s616_s30, 64  }
 0x12b   : > { %898 = vsyncadd (%p753_p2), %s616_s30, 4294967232  ;;  %s626_s9 = scalar_lea.sflag [#allocation5], %s615_s26 }
 0x12c   : > { %900 = dma.done.wait (%p753_p2), %s626_s9, 64  }
 0x12d   : > { %902 = vsyncadd (%p753_p2), %s626_s9, 4294967232  ;;  %s20_s17 = sadd.s32 1, %s925_s17   ;;  %s1227_s12 = smov %s909_s13 }
 0x12e   : > { %p17_p3 = scmp.ge.s32.totalorder %s20_s17, 4   ;;  %s1228_s13 = smov %s913_s14 }
 0x12f   : > { %s1229_s14 = smov %s1004_s25  ;;  %s1230_s15 = smov %s921_s16 }
 0x130   : > { %s1231_s16 = smov %s1233_s20  ;;  %19 = sbr.rel (!%p17_p3) target bundleno = 6 (0x6), region = 87 }
 0x135   :  { %632 = vsyncpa [#allocation3], 1 }
 0x136   :  { %634 = vsyncpa [#allocation3 + $0x1], 1 }
 0x137   :  { %635 = vsyncpa [#allocation5], 1 }
 0x138   :  { %637 = vsyncpa [#allocation5 + $0x1], 1 }

</bundles_post_ra>
